<compile_context>
chip_gen: v6e
topology: v6e:2x2x1
jax: 0.10.0
libtpu: 0.0.40
codegen_flags: <defaults>
</compile_context>

<pallas_src>
import functools
import math

import jax
import jax.numpy as jnp
from jax.experimental import pallas as pl
from jax.experimental.pallas import tpu as pltpu

_MB = 1024 * 1024


def _vmem_capacity_bytes():
    try:
        return int(pltpu.get_tpu_info().vmem_capacity_bytes)
    except Exception:
        return 64 * _MB                     # conservative default (v7x-class part)


_VMEM_CAP = _vmem_capacity_bytes()
_BIG_VMEM = _VMEM_CAP >= 96 * _MB           # v5e/v6e (128 MiB) vs v7x (64 MiB)
_ROW_TILE_BUDGET = (44 if _BIG_VMEM else 14) * _MB
_ATTN_VMEM_LIMIT = (80 if _BIG_VMEM else 40) * _MB
_MM_VMEM_LIMIT = (48 if _BIG_VMEM else 36) * _MB


def _fit_tile(dim, pref):
    """Largest tile <= pref that divides dim (falls back to the full dim)."""
    t = min(pref, dim)
    while dim % t != 0:
        t //= 2
    return max(t, 1)


def _pick_row_tile(np_nodes, hc, heads):
    """Row-block size for the attention kernel, sized against this chip's VMEM.

    Accounting (bytes): resident xh/s_src blocks are fixed; per row of a row block we
    pay ~8*Np for the double-buffered bf16 adjT+motif tiles plus ~28*Np for live f32
    (tile, Np) temporaries (mask bias, motif, scores, exp/softmax buffers)."""
    fixed = 2 * (np_nodes * hc * 2 + heads * np_nodes * 4 + hc * 4)
    per_row = 36 * np_nodes + 24 * hc + 8 * heads
    avail = max(_ROW_TILE_BUDGET - fixed, 8 * per_row)
    for t in (512, 256, 128, 64, 32, 16, 8):
        if np_nodes % t == 0 and t * per_row <= avail:
            return t
    return 8


# ----------------------------------------------------------------------------------
# Generic tiled matmul kernels (projections + the hoisted motif matrices)
# ----------------------------------------------------------------------------------

def _mm_kernel(a_ref, b_ref, o_ref, acc_ref, *, cast_bf16):
    @pl.when(pl.program_id(2) == 0)
    def _():
        acc_ref[...] = jnp.zeros_like(acc_ref)

    a = a_ref[...]
    b = b_ref[...]
    if cast_bf16:                           # bf16 MXU operands, f32 accumulation
        a = a.astype(jnp.bfloat16)
        b = b.astype(jnp.bfloat16)
    acc_ref[...] += jnp.dot(a, b, preferred_element_type=jnp.float32)

    @pl.when(pl.program_id(2) == pl.num_programs(2) - 1)
    def _():
        o_ref[...] = acc_ref[...].astype(o_ref.dtype)


def _mm_scale_kernel(a_ref, b_ref, s_ref, o_ref, acc_ref, *, cast_bf16):
    """o = (a @ b) * s   with s broadcast along rows (per-output-column scale)."""
    @pl.when(pl.program_id(2) == 0)
    def _():
        acc_ref[...] = jnp.zeros_like(acc_ref)

    a = a_ref[...]
    b = b_ref[...]
    if cast_bf16:
        a = a.astype(jnp.bfloat16)
        b = b.astype(jnp.bfloat16)
    acc_ref[...] += jnp.dot(a, b, preferred_element_type=jnp.float32)

    @pl.when(pl.program_id(2) == pl.num_programs(2) - 1)
    def _():
        o_ref[...] = (acc_ref[...] * s_ref[...]).astype(o_ref.dtype)


def pallas_matmul(a, b, *, scale=None, cast_bf16=False, out_dtype=jnp.float32,
                  tm=256, tn=256, tk=512):
    M, K = a.shape
    K2, N = b.shape
    assert K == K2
    tm = _fit_tile(M, tm)
    tn = _fit_tile(N, tn)
    tk = _fit_tile(K, tk)
    grid = (M // tm, N // tn, K // tk)

    in_specs = [pl.BlockSpec((tm, tk), lambda i, j, k: (i, k)),
                pl.BlockSpec((tk, tn), lambda i, j, k: (k, j))]
    args = [a, b]
    if scale is None:
        kernel = functools.partial(_mm_kernel, cast_bf16=cast_bf16)
    else:
        kernel = functools.partial(_mm_scale_kernel, cast_bf16=cast_bf16)
        in_specs.append(pl.BlockSpec((1, tn), lambda i, j, k: (0, j)))
        args.append(scale)

    vmem_limit = int(min(max(8 * (tm * tk + tk * tn + 2 * tm * tn), 32 * _MB),
                         _MM_VMEM_LIMIT))
    return pl.pallas_call(
        kernel,
        out_shape=jax.ShapeDtypeStruct((M, N), out_dtype),
        grid=grid,
        in_specs=in_specs,
        out_specs=pl.BlockSpec((tm, tn), lambda i, j, k: (i, j)),
        scratch_shapes=[pltpu.VMEM((tm, tn), jnp.float32)],
        compiler_params=pltpu.CompilerParams(
            dimension_semantics=("parallel", "parallel", "arbitrary"),
            vmem_limit_bytes=vmem_limit),
    )(*args)


# ----------------------------------------------------------------------------------
# Attention + aggregation kernel: grid = (node row-blocks,), heads looped in-kernel
# ----------------------------------------------------------------------------------

def _make_attn_kernel(*, heads, channels, negative_slope, beta, use_residual,
                      apply_elu):
    H, C = heads, channels
    ns = float(negative_slope)
    beta_f = float(beta)

    def kernel(s_dst_ref, s_src_ref, adjT_ref, motif_ref, xh_ref, *rest):
        if use_residual:
            res_ref, bias_ref, o_ref = rest
        else:
            bias_ref, o_ref = rest

        # Additive softmax mask, computed ONCE per row block, shared by all heads and
        # both softmaxes.  For masked (non-edge) positions exp(score - 1e30 - max)
        # underflows to exactly 0; padded rows (all-masked) produce harmless uniform
        # weights and never feed real nodes (their adjT columns are zero).
        maskbias = jnp.where(adjT_ref[...] > 0,
                             jnp.float32(0.0), jnp.float32(-1e30))      # (TI, Np)
        motif = motif_ref[...].astype(jnp.float32)                       # (TI, Np)
        s_dst = s_dst_ref[...]                                           # (TI, H)
        s_src = s_src_ref[...]                                           # (H, Np)

        def leaky(v):
            return jnp.where(v > 0, v, v * jnp.float32(ns))

        def masked_softmax(v):
            s = v + maskbias
            m = jnp.max(s, axis=-1, keepdims=True)
            p = jnp.exp(s - m)                          # masked entries -> exact 0
            denom = jnp.sum(p, axis=-1, keepdims=True)  # >= 1 (max entry contributes 1)
            return p * pl.reciprocal(denom, approx=True)       # EUP divide

        parts = []
        for h in range(H):                 # static unroll; heads share adjT/motif tiles
            scores = s_dst[:, h:h + 1] + s_src[h:h + 1, :]               # (TI, Np)
            a_first = masked_softmax(leaky(scores))
            a_motif = masked_softmax(leaky(scores * motif))
            alpha = jnp.float32(beta_f) * a_first + jnp.float32(1.0 - beta_f) * a_motif
            # TODO(synk): attention dropout (p=0.6) skipped -- eval-mode semantics.
            xh_h = xh_ref[:, pl.ds(h * C, C)]                            # (Np, C) bf16
            parts.append(jnp.dot(alpha.astype(jnp.bfloat16), xh_h,
                                 preferred_element_type=jnp.float32))    # (TI, C) MXU
        out = parts[0] if H == 1 else jnp.concatenate(parts, axis=-1)    # (TI, H*C)

        if use_residual:
            out = out + res_ref[...]
        out = out + bias_ref[...]
        if apply_elu:                                   # inter-layer ELU fused here
            out = jnp.where(out > 0, out, jnp.exp(out) - 1.0)
        o_ref[...] = out.astype(o_ref.dtype)            # one store per row block

    return kernel


def motif_gat_layer(x, adjT_bf16, motif_bf16, params, *, heads, out_channels,
                    negative_slope=0.2, beta=0.5, use_residual=False,
                    residual_identity=False, apply_elu=False):
    Np, _ = x.shape
    H, C = heads, out_channels
    HC = H * C

    # --- projections: tiled Pallas matmuls, bf16 operands / f32 accumulate ---
    xp = pallas_matmul(x, params["w"], cast_bf16=True)                  # (Np, HC) f32
    xp3 = xp.reshape(Np, H, C)

    # per-node / per-head attention scores, computed once (tiny XLA einsums)
    s_src = jnp.einsum("nhc,hc->hn", xp3, params["att_src"])            # (H, Np)
    s_dst = jnp.einsum("nhc,hc->nh", xp3, params["att_dst"])            # (Np, H)

    xh = xp.astype(jnp.bfloat16)          # resident (Np, HC) bf16, no transpose needed
    bias2 = params["bias"].reshape(1, HC)

    tile_i = _pick_row_tile(Np, HC, H)
    args = [s_dst, s_src, adjT_bf16, motif_bf16, xh]
    in_specs = [
        pl.BlockSpec((tile_i, H), lambda i: (i, 0)),       # s_dst (target scores)
        pl.BlockSpec((H, Np), lambda i: (0, 0)),           # s_src (source scores, resident)
        pl.BlockSpec((tile_i, Np), lambda i: (i, 0)),      # adjT tile   (bf16)
        pl.BlockSpec((tile_i, Np), lambda i: (i, 0)),      # motif tile  (bf16)
        pl.BlockSpec((Np, HC), lambda i: (0, 0)),          # xh resident (bf16)
    ]
    if use_residual:
        if residual_identity:
            res = x                                                      # Fin == HC
        else:
            res = pallas_matmul(x, params["res_w"], cast_bf16=True)      # (Np, HC)
        args.append(res)
        in_specs.append(pl.BlockSpec((tile_i, HC), lambda i: (i, 0)))
    args.append(bias2)
    in_specs.append(pl.BlockSpec((1, HC), lambda i: (0, 0)))

    kernel = _make_attn_kernel(heads=H, channels=C, negative_slope=negative_slope,
                               beta=beta, use_residual=use_residual,
                               apply_elu=apply_elu)

    # Output written directly in (Np, H*C) layout -> no trailing transpose/reshape.
    # NOTE: pick hidden_channels so H*C is a multiple of 128 for fully lane-dense
    # stores / a fuller MXU N dimension at production sizes.
    out = pl.pallas_call(
        kernel,
        out_shape=jax.ShapeDtypeStruct((Np, HC), jnp.float32),
        grid=(Np // tile_i,),
        in_specs=in_specs,
        out_specs=pl.BlockSpec((tile_i, HC), lambda i: (i, 0)),
        compiler_params=pltpu.CompilerParams(
            dimension_semantics=("parallel",),   # row blocks shard across v7x's 2 TCs
            vmem_limit_bytes=_ATTN_VMEM_LIMIT),
    )(*args)
    return out


# ----------------------------------------------------------------------------------
# Graph preprocessing (adjacency + motif, computed once per forward pass)
# ----------------------------------------------------------------------------------

def build_adjacency(edge_index, num_nodes, padded_nodes):
    """Dense A^T after remove_self_loops + add_self_loops, zero-padded."""
    src, dst = edge_index[0], edge_index[1]
    A = jnp.zeros((num_nodes, num_nodes), jnp.float32).at[src, dst].set(1.0)
    eye = jnp.eye(num_nodes, dtype=jnp.float32)
    A = A * (1.0 - eye) + eye
    adjT = A.T
    pad = padded_nodes - num_nodes
    if pad:
        adjT = jnp.pad(adjT, ((0, pad), (0, pad)))
    return adjT


def compute_motif_t(adjT):
    """motif_t[i, j] = A^3[j, i] / max(rowsum_j(A^3), 1)   (transposed, normalized).

    A^3 / rowsum math stays in f32 (exact path counts); the first matmul always uses
    bf16 MXU operands (0/1 is exact), the second only when the 2-path counts are
    provably exact in bf16 (Np <= 256).  The normalized result is stored bf16."""
    Np = adjT.shape[0]
    B2 = pallas_matmul(adjT, adjT, cast_bf16=True)                   # (A^T)^2, f32
    # rowsum_j(A^3) = ones @ (A^T)^3 — cheap f32 matvec chain in XLA
    colsum = jnp.dot(jnp.dot(jnp.ones((1, Np), jnp.float32), B2), adjT)
    inv = 1.0 / jnp.maximum(colsum, 1.0)                             # (1, Np)
    return pallas_matmul(B2, adjT, scale=inv, cast_bf16=(Np <= 256),
                         out_dtype=jnp.bfloat16)                     # (A^T)^3 * inv


# ----------------------------------------------------------------------------------
# Model construction / forward
# ----------------------------------------------------------------------------------

def _glorot(key, shape):
    lim = math.sqrt(6.0 / (shape[0] + shape[1]))
    return jax.random.uniform(key, shape, jnp.float32, -lim, lim)


def make_layer_params(key, in_ch, out_ch, heads, residual):
    hc = heads * out_ch
    k0, k1, k2, k3 = jax.random.split(key, 4)
    params = {
        "w": _glorot(k0, (in_ch, hc)),
        "att_src": _glorot(k1, (heads, out_ch)),
        "att_dst": _glorot(k2, (heads, out_ch)),
        "bias": jnp.zeros((hc,), jnp.float32),          # zeros() init, as in the module
    }
    residual_identity = residual and (in_ch == hc)
    if residual and not residual_identity:
        params["res_w"] = _glorot(k3, (in_ch, hc))
    return params, residual_identity


def build_mgat(key, in_channels, hidden_channels, out_channels,
               num_layers=2, heads=8, beta=0.5, residual=True):
    layers = []
    keys = jax.random.split(key, num_layers)
    # first layer: residual=False, concat=True
    p, rid = make_layer_params(keys[0], in_channels, hidden_channels, heads,
                               residual=False)
    layers.append((p, dict(heads=heads, out_channels=hidden_channels,
                           negative_slope=0.2, beta=beta,
                           use_residual=False, residual_identity=rid)))
    # middle layers
    for li in range(num_layers - 2):
        p, rid = make_layer_params(keys[1 + li], hidden_channels * heads,
                                   hidden_channels, heads, residual=residual)
        layers.append((p, dict(heads=heads, out_channels=hidden_channels,
                               negative_slope=0.2, beta=beta,
                               use_residual=residual, residual_identity=rid)))
    # last layer: heads=1, concat=False (mean over 1 head == identity)
    p, rid = make_layer_params(keys[-1], hidden_channels * heads, out_channels,
                               heads=1, residual=residual)
    layers.append((p, dict(heads=1, out_channels=out_channels,
                           negative_slope=0.2, beta=beta,
                           use_residual=residual, residual_identity=rid)))
    return layers


def mgat_forward(x, edge_index, layers):
    N = x.shape[0]
    Np = max(256, ((N + 255) // 256) * 256)    # pad nodes to a 256 multiple (MXU depth)

    adjT = build_adjacency(edge_index, N, Np)      # (Np, Np) f32
    motif_bf16 = compute_motif_t(adjT)             # hoisted: once per forward, bf16
    adjT_bf16 = adjT.astype(jnp.bfloat16)          # 0/1 mask: exact in bf16, half DMA

    h = jnp.pad(x, ((0, Np - N), (0, 0))) if Np != N else x
    n_layers = len(layers)
    for li, (params, cfg) in enumerate(layers):
        h = motif_gat_layer(h, adjT_bf16, motif_bf16, params,
                            apply_elu=(li < n_layers - 1), **cfg)
        # TODO(synk): feature dropout (p=0.6) skipped — eval-mode semantics.
    return h[:N]


if __name__ == "__main__":
    key = jax.random.PRNGKey(0)
    k_x, k_model = jax.random.split(key)

    # small graph: 16 nodes, directed ring (both ways) + chords
    N, IN_CH, HIDDEN, OUT_CH, HEADS = 16, 16, 8, 4, 4
    src, dst = [], []
    for i in range(N):
        src += [i, (i + 1) % N, i]
        dst += [(i + 1) % N, i, (i + 3) % N]
    edge_index = jnp.array([src, dst], dtype=jnp.int32)          # (2, 48)

    x = jax.random.normal(k_x, (N, IN_CH), jnp.float32)

    layers = build_mgat(k_model, IN_CH, HIDDEN, OUT_CH,
                        num_layers=2, heads=HEADS, beta=0.5, residual=True)

    out = mgat_forward(x, edge_index, layers)
    out = jax.block_until_ready(out)
    assert out.shape == (N, OUT_CH), out.shape
    assert out.dtype == jnp.float32
    print("KERNEL_OK")
</pallas_src>

<mosaic_0001>
module attributes {stable_mosaic.version = 11 : i64} {
  func.func @_mm_kernel(%arg0: i32, %arg1: i32, %arg2: i32, %arg3: memref<256x256xf32, #tpu.memory_space<vmem>>, %arg4: memref<256x256xf32, #tpu.memory_space<vmem>>, %arg5: memref<256x256xf32, #tpu.memory_space<vmem>>, %arg6: memref<256x256xf32, #tpu.memory_space<vmem>>) attributes {dimension_semantics = [#tpu.dimension_semantics<parallel>, #tpu.dimension_semantics<parallel>, #tpu.dimension_semantics<arbitrary>], iteration_bounds = array<i64: 1, 1, 1>, scalar_prefetch = 0 : i64, scratch_operands = 1 : i64, tpu.core_type = #tpu.core_type<tc>, window_params = [{transform_indices = @transform_0, window_bounds = array<i64: 256, 256>}, {transform_indices = @transform_1, window_bounds = array<i64: 256, 256>}, {transform_indices = @transform_2, window_bounds = array<i64: 256, 256>}]} {
    %c0_i32 = arith.constant 0 : i32
    %0 = arith.cmpi eq, %arg2, %c0_i32 : i32
    %1 = arith.extui %0 : i1 to i32
    %c0_i32_0 = arith.constant 0 : i32
    %2 = arith.cmpi ne, %1, %c0_i32_0 : i32
    scf.if %2 {
      %cst_10 = arith.constant 0.000000e+00 : f32
      %14 = vector.broadcast %cst_10 : f32 to vector<256x256xf32>
      %c0_11 = arith.constant 0 : index
      %c0_12 = arith.constant 0 : index
      %15 = vector.load %arg6[%c0_11, %c0_12] : memref<256x256xf32, #tpu.memory_space<vmem>>, vector<256x256xf32>
      tpu.vector_store %arg6[%c0_11, %c0_12], %14 {strides = array<i32>} : memref<256x256xf32, #tpu.memory_space<vmem>>, vector<256x256xf32>,
    } else {
    }
    %c0 = arith.constant 0 : index
    %c0_1 = arith.constant 0 : index
    %3 = vector.load %arg3[%c0, %c0_1] : memref<256x256xf32, #tpu.memory_space<vmem>>, vector<256x256xf32>
    %c0_2 = arith.constant 0 : index
    %c0_3 = arith.constant 0 : index
    %4 = vector.load %arg4[%c0_2, %c0_3] : memref<256x256xf32, #tpu.memory_space<vmem>>, vector<256x256xf32>
    %5 = arith.truncf %3 : vector<256x256xf32> to vector<256x256xbf16>
    %6 = arith.truncf %4 : vector<256x256xf32> to vector<256x256xbf16>
    %c0_4 = arith.constant 0 : index
    %c0_5 = arith.constant 0 : index
    %7 = vector.load %arg6[%c0_4, %c0_5] : memref<256x256xf32, #tpu.memory_space<vmem>>, vector<256x256xf32>
    %cst = arith.constant dense<0.000000e+00> : vector<256x256xf32>
    %8 = tpu.matmul %5, %6, %cst {dimension_numbers = #tpu.dot_dimension_numbers<[1], [0], [0], [1], [0, 0, 1, 1], [], []>} : vector<256x256xbf16>, vector<256x256xbf16>, vector<256x256xf32> -> vector<256x256xf32>
    %9 = arith.addf %7, %8 : vector<256x256xf32>
    %c0_6 = arith.constant 0 : index
    %c0_7 = arith.constant 0 : index
    %10 = vector.load %arg6[%c0_6, %c0_7] : memref<256x256xf32, #tpu.memory_space<vmem>>, vector<256x256xf32>
    tpu.vector_store %arg6[%c0_6, %c0_7], %9 {strides = array<i32>} : memref<256x256xf32, #tpu.memory_space<vmem>>, vector<256x256xf32>,
    %c0_i32_8 = arith.constant 0 : i32
    %11 = arith.cmpi eq, %arg2, %c0_i32_8 : i32
    %12 = arith.extui %11 : i1 to i32
    %c0_i32_9 = arith.constant 0 : i32
    %13 = arith.cmpi ne, %12, %c0_i32_9 : i32
    scf.if %13 {
      %c0_10 = arith.constant 0 : index
      %c0_11 = arith.constant 0 : index
      %14 = vector.load %arg6[%c0_10, %c0_11] : memref<256x256xf32, #tpu.memory_space<vmem>>, vector<256x256xf32>
      %c0_12 = arith.constant 0 : index
      %c0_13 = arith.constant 0 : index
      %15 = vector.load %arg5[%c0_12, %c0_13] : memref<256x256xf32, #tpu.memory_space<vmem>>, vector<256x256xf32>
      tpu.vector_store %arg5[%c0_12, %c0_13], %14 {strides = array<i32>} : memref<256x256xf32, #tpu.memory_space<vmem>>, vector<256x256xf32>,
    } else {
    }
    return
  }
  func.func @transform_0(%arg0: i32, %arg1: i32, %arg2: i32) -> (i32, i32) {
    %c0_i32 = arith.constant 0 : i32
    return %arg0, %arg2 : i32, i32
  }
  func.func @transform_1(%arg0: i32, %arg1: i32, %arg2: i32) -> (i32, i32) {
    %c0_i32 = arith.constant 0 : i32
    return %arg2, %arg1 : i32, i32
  }
  func.func @transform_2(%arg0: i32, %arg1: i32, %arg2: i32) -> (i32, i32) {
    %c0_i32 = arith.constant 0 : i32
    return %arg0, %arg1 : i32, i32
  }
}

</mosaic_0001>

<bundles_post_ra>
// kernel: tpu_custom_call.1
= control target key start
LH: loop header
LB: loop body
LE: loop exit
PB: predicated region body
PF: predicated region fallthrough
CT: control target
= control target key end

     0   :  { %7 = vsyncpa [#allocation4], 0  ;;  %s975_s0 = inlined_call_operand.hbm [shape: f32[256,256], index: 0, kind: input, shape index: {}]   ;;  %s976_s1 = inlined_call_operand.hbm [shape: f32[256,256], index: 1, kind: input, shape index: {}]   ;;  %s977_s2 = inlined_call_operand.hbm [shape: f32[256,256], index: 2, kind: output, shape index: {}]  }
   0x1   :  { %8 = vsyncpa [#allocation7], 0 }
   0x2   :  { %9 = vsyncpa [#allocation5], 0  ;;  %s937_s9 = smov [#allocation3]  }
   0x3   :  { %s15_s10 = sshll.u32 %s937_s9, 4  ;;  %s16_s10 = int_to_ptr.vmem [resolvable:$true] %s15_s10 }
   0x4   :  { %s879_s11 = scalar_lea.vmem %s16_s10, 8192  ;;  %p884_p1 = scmp.lt.s32.totalorder %s16_s10, %s16_s10 }
   0x5   :  { %p880_p0 = scmp.ne.s32.totalorder %s16_s10, %s879_s11  ;;  %p885_p2 = scmp.lt.s32.totalorder %s879_s11, %s879_s11 }
   0x7   :  { %p886_p3 = por %p885_p2, %p884_p1 }
   0x9   :  { %p887_p4 = pnand %p886_p3, %p880_p0 }
   0xb   :  { %890 = shalt.err (!%p887_p4)
}
   0xc   :  { %s938_s12 = smov 256   ;;  %s939_s13 = smov 16  }
   0xd   :  { %21 = dma.hbm_to_vmem [thread:$0]  %s975_s0, 8192, %s16_s10, [#allocation4], %s938_s12, %s938_s12, %s939_s13  }
   0xe   :  { %s940_s16 = smov [#allocation6]  }
   0xf   :  { %s27_s17 = sshll.u32 %s940_s16, 4  ;;  %s28_s17 = int_to_ptr.vmem [resolvable:$true] %s27_s17 }
  0x10   :  { %s899_s18 = scalar_lea.vmem %s28_s17, 8192  ;;  %p904_p6 = scmp.lt.s32.totalorder %s28_s17, %s28_s17 }
  0x11   :  { %p900_p5 = scmp.ne.s32.totalorder %s28_s17, %s899_s18  ;;  %p905_p7 = scmp.lt.s32.totalorder %s899_s18, %s899_s18 }
  0x13   :  { %p906_p8 = por %p905_p7, %p904_p6 }
  0x15   :  { %p907_p9 = pnand %p906_p8, %p900_p5 }
  0x17   :  { %910 = shalt.err (!%p907_p9)
}
  0x18   :  { %33 = dma.hbm_to_vmem [thread:$0]  %s976_s1, 8192, %s28_s17, [#allocation7], %s938_s12, %s938_s12, %s939_s13  }
  0x19   :  { %931 = dma.done.wait [#allocation4], 8192  }
  0x1a   :  { %932 = vsyncadd [#allocation4], 4294959104 }
  0x1b   :  { %933 = dma.done.wait [#allocation7], 8192  }
  0x1c   :  { %934 = vsyncadd [#allocation7], 4294959104  ;;  %v201_v0 = vld [vmem:[#allocation6 + $0xe8] sm:$0xff]  ;;  %v203_v1 = vld [vmem:[#allocation6 + $0xf8] sm:$0xff]  ;;  %s941_s0 = smov [#allocation8]  }
  0x1d   :  { %v200_v2 = vld [vmem:[#allocation6 + $0xe0] sm:$0xff]  ;;  %v283_v3 = vpack.c.bf16 %v203_v1, %v201_v0  ;;  %v202_v4 = vld [vmem:[#allocation6 + $0xf0] sm:$0xff]  ;;  %v197_v5 = vld [vmem:[#allocation6 + $0xc8] sm:$0xff]  ;;  %s821_s1 = sshll.u32 %s941_s0, 4  ;;  %s822_s1 = int_to_ptr.vmem [resolvable:$true] %s821_s1 }
  0x1e   :  { %v199_v6 = vld [vmem:[#allocation6 + $0xd8] sm:$0xff]  ;;  %v282_v7 = vpack.c.bf16 %v202_v4, %v200_v2  ;;  %v196_v9 = vld [vmem:[#allocation6 + $0xc0] sm:$0xff]  ;;  %v198_v10 = vld [vmem:[#allocation6 + $0xd0] sm:$0xff]  ;;  %s911_s21 = scalar_lea.vmem %s822_s1, 8192  ;;  %p916_p11 = scmp.lt.s32.totalorder %s822_s1, %s822_s1 }
  0x1f   :  { %v281_v8 = vpack.c.bf16 %v199_v6, %v197_v5  ;;  %v193_v11 = vld [vmem:[#allocation6 + $0xa8] sm:$0xff]  ;;  %364 = vmatprep.subr.bf16.mxu0 %v283_v3  ;;  %834 = vmatprep.subr.bf16.mxu1 %v283_v3  ;;  %v195_v12 = vld [vmem:[#allocation6 + $0xb8] sm:$0xff]  ;;  %v280_v13 = vpack.c.bf16 %v198_v10, %v196_v9  ;;  %v192_v15 = vld [vmem:[#allocation6 + $0xa0] sm:$0xff]  ;;  %p912_p10 = scmp.ne.s32.totalorder %s822_s1, %s911_s21  ;;  %p917_p12 = scmp.lt.s32.totalorder %s911_s21, %s911_s21 }
  0x20   :  { %365 = vmatpush1.bf16.msra.mxu0 %v282_v7  ;;  %850 = vmatpush1.bf16.msra.mxu1 %v282_v7  ;;  %v279_v14 = vpack.c.bf16 %v195_v12, %v193_v11  ;;  %v194_v16 = vld [vmem:[#allocation6 + $0xb0] sm:$0xff]  ;;  %v189_v17 = vld [vmem:[#allocation6 + $0x88] sm:$0xff]  ;;  %v191_v18 = vld [vmem:[#allocation6 + $0x98] sm:$0xff] }
  0x21   :  { %366 = vmatprep.subr.bf16.mxu0 %v281_v8  ;;  %835 = vmatprep.subr.bf16.mxu1 %v281_v8  ;;  %v278_v19 = vpack.c.bf16 %v194_v16, %v192_v15  ;;  %v277_v20 = vpack.c.bf16 %v191_v18, %v189_v17  ;;  %v188_v21 = vld [vmem:[#allocation6 + $0x80] sm:$0xff]  ;;  %v190_v22 = vld [vmem:[#allocation6 + $0x90] sm:$0xff]  ;;  %v185_v23 = vld [vmem:[#allocation6 + $0x68] sm:$0xff]  ;;  %p918_p13 = por %p917_p12, %p916_p11 }
  0x22   :  { %v187_v24 = vld [vmem:[#allocation6 + $0x78] sm:$0xff]  ;;  %v276_v25 = vpack.c.bf16 %v190_v22, %v188_v21  ;;  %v184_v27 = vld [vmem:[#allocation6 + $0x60] sm:$0xff]  ;;  %v186_v28 = vld [vmem:[#allocation6 + $0x70] sm:$0xff] }
  0x23   :  { %v275_v26 = vpack.c.bf16 %v187_v24, %v185_v23  ;;  %v181_v29 = vld [vmem:[#allocation6 + $0x48] sm:$0xff]  ;;  %v183_v30 = vld [vmem:[#allocation6 + $0x58] sm:$0xff]  ;;  %v274_v31 = vpack.c.bf16 %v186_v28, %v184_v27  ;;  %v180_v33 = vld [vmem:[#allocation6 + $0x40] sm:$0xff]  ;;  %p919_p0 = pnand %p918_p13, %p912_p10 }
  0x24   :  { %367 = vmatpush1.bf16.msra.mxu0 %v280_v13  ;;  %851 = vmatpush1.bf16.msra.mxu1 %v280_v13  ;;  %v273_v32 = vpack.c.bf16 %v183_v30, %v181_v29  ;;  %v182_v34 = vld [vmem:[#allocation6 + $0x50] sm:$0xff]  ;;  %v177_v35 = vld [vmem:[#allocation6 + $0x28] sm:$0xff]  ;;  %v179_v36 = vld [vmem:[#allocation6 + $0x38] sm:$0xff] }
  0x25   :  { %368 = vmatprep.subr.bf16.mxu0 %v279_v14  ;;  %836 = vmatprep.subr.bf16.mxu1 %v279_v14  ;;  %v272_v37 = vpack.c.bf16 %v182_v34, %v180_v33  ;;  %v176_v38 = vld [vmem:[#allocation6 + $0x20] sm:$0xff]  ;;  %v178_v39 = vld [vmem:[#allocation6 + $0x30] sm:$0xff]  ;;  %v271_v40 = vpack.c.bf16 %v179_v36, %v177_v35  ;;  %v173_v41 = vld [vmem:[#allocation6 + $0x8] sm:$0xff] }
  0x26   :  { %v109_v42 = vld [vmem:[#allocation3 + $0x8] sm:$0xff]  ;;  %v111_v43 = vld [vmem:[#allocation3 + $0x18] sm:$0xff]  ;;  %v270_v49 = vpack.c.bf16 %v178_v39, %v176_v38  ;;  %v172_v51 = vld [vmem:[#allocation6] sm:$0xff] }
  0x27   :  { %v175_v44 = vld [vmem:[#allocation6 + $0x18] sm:$0xff]  ;;  %v237_v45 = vpack.c.bf16 %v111_v43, %v109_v42  ;;  %v141_v46 = vld [vmem:[#allocation3 + $0x108] sm:$0xff]  ;;  %v174_v52 = vld [vmem:[#allocation6 + $0x10] sm:$0xff] }
  0x28   :  { %369 = vmatpush1.bf16.msra.mxu0 %v278_v19  ;;  %852 = vmatpush1.bf16.msra.mxu1 %v278_v19  ;;  %v143_v47 = vld [vmem:[#allocation3 + $0x118] sm:$0xff]  ;;  %v269_v50 = vpack.c.bf16 %v175_v44, %v173_v41  ;;  %v233_v53 = vld [vmem:[#allocation6 + $0x1e8] sm:$0xff]  ;;  %v268_v55 = vpack.c.bf16 %v174_v52, %v172_v51  ;;  %v232_v57 = vld [vmem:[#allocation6 + $0x1e0] sm:$0xff] }
  0x29   :  { %370 = vmatprep.subr.bf16.mxu0 %v277_v20  ;;  %837 = vmatprep.subr.bf16.mxu1 %v277_v20  ;;  %v253_v48 = vpack.c.bf16 %v143_v47, %v141_v46  ;;  %v235_v54 = vld [vmem:[#allocation6 + $0x1f8] sm:$0xff]  ;;  %v234_v58 = vld [vmem:[#allocation6 + $0x1f0] sm:$0xff]  ;;  %v229_v59 = vld [vmem:[#allocation6 + $0x1c8] sm:$0xff] }
  0x2a   :  { %396 = vmatprep.mubr.bf16.mxu0 %v237_v45  ;;  %v299_v56 = vpack.c.bf16 %v235_v54, %v233_v53  ;;  %v231_v60 = vld [vmem:[#allocation6 + $0x1d8] sm:$0xff]  ;;  %v298_v61 = vpack.c.bf16 %v234_v58, %v232_v57  ;;  %v228_v63 = vld [vmem:[#allocation6 + $0x1c0] sm:$0xff]  ;;  %v230_v0 = vld [vmem:[#allocation6 + $0x1d0] sm:$0xff] }
  0x2b   :  { %476 = vmatprep.mubr.bf16.mxu1 %v253_v48  ;;  %v297_v62 = vpack.c.bf16 %v231_v60, %v229_v59  ;;  %v225_v1 = vld [vmem:[#allocation6 + $0x1a8] sm:$0xff]  ;;  %v227_v2 = vld [vmem:[#allocation6 + $0x1b8] sm:$0xff]  ;;  %v296_v3 = vpack.c.bf16 %v230_v0, %v228_v63  ;;  %v224_v5 = vld [vmem:[#allocation6 + $0x1a0] sm:$0xff] }
  0x2c   :  { %371 = vmatpush1.bf16.msra.mxu0 %v276_v25  ;;  %853 = vmatpush1.bf16.msra.mxu1 %v276_v25  ;;  %v295_v4 = vpack.c.bf16 %v227_v2, %v225_v1  ;;  %v226_v6 = vld [vmem:[#allocation6 + $0x1b0] sm:$0xff]  ;;  %v221_v7 = vld [vmem:[#allocation6 + $0x188] sm:$0xff]  ;;  %v223_v8 = vld [vmem:[#allocation6 + $0x198] sm:$0xff] }
  0x2d   :  { %372 = vmatprep.subr.bf16.mxu0 %v275_v26  ;;  %838 = vmatprep.subr.bf16.mxu1 %v275_v26  ;;  %v294_v9 = vpack.c.bf16 %v226_v6, %v224_v5  ;;  %v293_v10 = vpack.c.bf16 %v223_v8, %v221_v7  ;;  %v220_v11 = vld [vmem:[#allocation6 + $0x180] sm:$0xff]  ;;  %v222_v12 = vld [vmem:[#allocation6 + $0x190] sm:$0xff]  ;;  %v217_v13 = vld [vmem:[#allocation6 + $0x168] sm:$0xff] }
  0x2e   :  { %v219_v14 = vld [vmem:[#allocation6 + $0x178] sm:$0xff]  ;;  %v292_v15 = vpack.c.bf16 %v222_v12, %v220_v11  ;;  %v216_v17 = vld [vmem:[#allocation6 + $0x160] sm:$0xff]  ;;  %v218_v18 = vld [vmem:[#allocation6 + $0x170] sm:$0xff] }
  0x2f   :  { %v291_v16 = vpack.c.bf16 %v219_v14, %v217_v13  ;;  %v213_v19 = vld [vmem:[#allocation6 + $0x148] sm:$0xff]  ;;  %v215_v20 = vld [vmem:[#allocation6 + $0x158] sm:$0xff]  ;;  %v290_v21 = vpack.c.bf16 %v218_v18, %v216_v17  ;;  %v212_v23 = vld [vmem:[#allocation6 + $0x140] sm:$0xff] }
  0x30   :  { %373 = vmatpush1.bf16.msra.mxu0 %v274_v31  ;;  %854 = vmatpush1.bf16.msra.mxu1 %v274_v31  ;;  %v289_v22 = vpack.c.bf16 %v215_v20, %v213_v19  ;;  %v214_v24 = vld [vmem:[#allocation6 + $0x150] sm:$0xff]  ;;  %v209_v25 = vld [vmem:[#allocation6 + $0x128] sm:$0xff]  ;;  %v211_v26 = vld [vmem:[#allocation6 + $0x138] sm:$0xff] }
  0x31   :  { %374 = vmatprep.subr.bf16.mxu0 %v273_v32  ;;  %839 = vmatprep.subr.bf16.mxu1 %v273_v32  ;;  %v288_v27 = vpack.c.bf16 %v214_v24, %v212_v23  ;;  %v287_v28 = vpack.c.bf16 %v211_v26, %v209_v25  ;;  %v208_v29 = vld [vmem:[#allocation6 + $0x120] sm:$0xff]  ;;  %v210_v30 = vld [vmem:[#allocation6 + $0x130] sm:$0xff]  ;;  %v205_v31 = vld [vmem:[#allocation6 + $0x108] sm:$0xff] }
  0x32   :  { %v207_v32 = vld [vmem:[#allocation6 + $0x118] sm:$0xff]  ;;  %v286_v33 = vpack.c.bf16 %v210_v30, %v208_v29  ;;  %v204_v35 = vld [vmem:[#allocation6 + $0x100] sm:$0xff]  ;;  %v206_v36 = vld [vmem:[#allocation6 + $0x110] sm:$0xff] }
  0x33   :  { %v285_v34 = vpack.c.bf16 %v207_v32, %v205_v31  ;;  %v110_v38 = vld [vmem:[#allocation3 + $0x10] sm:$0xff]  ;;  %v284_v39 = vpack.c.bf16 %v206_v36, %v204_v35  ;;  %v113_v42 = vld [vmem:[#allocation3 + $0x28] sm:$0xff]  ;;  %v115_v43 = vld [vmem:[#allocation3 + $0x38] sm:$0xff] }
  0x34   :  { %375 = vmatpush1.bf16.msra.mxu0 %v272_v37  ;;  %855 = vmatpush1.bf16.msra.mxu1 %v272_v37  ;;  %v108_v37 = vld [vmem:[#allocation3] sm:$0xff]  ;;  %v142_v41 = vld [vmem:[#allocation3 + $0x110] sm:$0xff]  ;;  %v145_v44 = vld [vmem:[#allocation3 + $0x128] sm:$0xff]  ;;  %v239_v48 = vpack.c.bf16 %v115_v43, %v113_v42 }
  0x35   :  { %376 = vmatprep.subr.bf16.mxu0 %v271_v40  ;;  %840 = vmatprep.subr.bf16.mxu1 %v271_v40  ;;  %v140_v40 = vld [vmem:[#allocation3 + $0x100] sm:$0xff]  ;;  %v147_v45 = vld [vmem:[#allocation3 + $0x138] sm:$0xff]  ;;  %v236_v46 = vpack.c.bf16 %v110_v38, %v108_v37  ;;  %v114_v51 = vld [vmem:[#allocation3 + $0x30] sm:$0xff] }
  0x36   :  { %v252_v47 = vpack.c.bf16 %v142_v41, %v140_v40  ;;  %v144_v52 = vld [vmem:[#allocation3 + $0x120] sm:$0xff]  ;;  %v146_v53 = vld [vmem:[#allocation3 + $0x130] sm:$0xff]  ;;  %v117_v54 = vld [vmem:[#allocation3 + $0x48] sm:$0xff] }
  0x37   :  { %v151_v57 = vld [vmem:[#allocation3 + $0x158] sm:$0xff]  ;;  %v254_v59 = vpack.c.bf16 %v146_v53, %v144_v52  ;;  %v118_v63 = vld [vmem:[#allocation3 + $0x50] sm:$0xff]  ;;  %v148_v0 = vld [vmem:[#allocation3 + $0x140] sm:$0xff] }
  0x38   :  { %377 = vmatpush1.bf16.msra.mxu0 %v270_v49  ;;  %856 = vmatpush1.bf16.msra.mxu1 %v270_v49  ;;  %v255_v49 = vpack.c.bf16 %v147_v45, %v145_v44  ;;  %v150_v1 = vld [vmem:[#allocation3 + $0x150] sm:$0xff]  ;;  %v121_v2 = vld [vmem:[#allocation3 + $0x68] sm:$0xff]  ;;  %v155_v5 = vld [vmem:[#allocation3 + $0x178] sm:$0xff] }
  0x39   :  { %378 = vmatprep.subr.bf16.mxu0 %v269_v50  ;;  %841 = vmatprep.subr.bf16.mxu1 %v269_v50  ;;  %v112_v50 = vld [vmem:[#allocation3 + $0x20] sm:$0xff]  ;;  %v256_v7 = vpack.c.bf16 %v150_v1, %v148_v0  ;;  %v122_v11 = vld [vmem:[#allocation3 + $0x70] sm:$0xff]  ;;  %v125_v14 = vld [vmem:[#allocation3 + $0x88] sm:$0xff] }
  0x3a   :  { %v238_v58 = vpack.c.bf16 %v114_v51, %v112_v50  ;;  %v152_v12 = vld [vmem:[#allocation3 + $0x160] sm:$0xff]  ;;  %v154_v13 = vld [vmem:[#allocation3 + $0x170] sm:$0xff]  ;;  %v159_v17 = vld [vmem:[#allocation3 + $0x198] sm:$0xff] }
  0x3b   :  { %v258_v19 = vpack.c.bf16 %v154_v13, %v152_v12  ;;  %v126_v23 = vld [vmem:[#allocation3 + $0x90] sm:$0xff]  ;;  %v156_v24 = vld [vmem:[#allocation3 + $0x180] sm:$0xff]  ;;  %v129_v26 = vld [vmem:[#allocation3 + $0xa8] sm:$0xff] }
  0x3c   :  { %379 = vmatpush1.bf16.msra.mxu0 %v268_v55  ;;  %857 = vmatpush1.bf16.msra.mxu1 %v268_v55  ;;  %v119_v55 = vld [vmem:[#allocation3 + $0x58] sm:$0xff]  ;;  %v158_v25 = vld [vmem:[#allocation3 + $0x190] sm:$0xff]  ;;  %v160_v36 = vld [vmem:[#allocation3 + $0x1a0] sm:$0xff] }
  0x3d   :  { %380 = vmatprep.subr.bf16.mxu0 %v299_v56  ;;  %842 = vmatprep.subr.bf16.mxu1 %v299_v56  ;;  %v149_v56 = vld [vmem:[#allocation3 + $0x148] sm:$0xff]  ;;  %v241_v60 = vpack.c.bf16 %v119_v55, %v117_v54  ;;  %v163_v29 = vld [vmem:[#allocation3 + $0x1b8] sm:$0xff]  ;;  %v260_v31 = vpack.c.bf16 %v158_v25, %v156_v24  ;;  %v130_v35 = vld [vmem:[#allocation3 + $0xb0] sm:$0xff] }
  0x3e   :  { %v162_v37 = vld [vmem:[#allocation3 + $0x1b0] sm:$0xff]  ;;  %v133_v38 = vld [vmem:[#allocation3 + $0xc8] sm:$0xff]  ;;  %v167_v41 = vld [vmem:[#allocation3 + $0x1d8] sm:$0xff] }
  0x3f   :  { %v165_v40 = vld [vmem:[#allocation3 + $0x1c8] sm:$0xff]  ;;  %v262_v43 = vpack.c.bf16 %v162_v37, %v160_v36  ;;  %v139_v51 = vld [vmem:[#allocation3 + $0xf8] sm:$0xff] }
  0x40   :  { %381 = vmatpush2.bf16.msra.mxu0 %v298_v61  ;;  %858 = vmatpush2.bf16.msra.mxu1 %v298_v61  ;;  %v257_v61 = vpack.c.bf16 %v151_v57, %v149_v56  ;;  %v265_v45 = vpack.c.bf16 %v167_v41, %v165_v40  ;;  %v137_v50 = vld [vmem:[#allocation3 + $0xe8] sm:$0xff]  ;;  %v171_v53 = vld [vmem:[#allocation3 + $0x1f8] sm:$0xff] }
  0x41   :  { %382 = vmatprep.subr.bf16.mxu0 %v297_v62  ;;  %843 = vmatprep.subr.bf16.mxu1 %v297_v62  ;;  %v116_v62 = vld [vmem:[#allocation3 + $0x40] sm:$0xff]  ;;  %v169_v52 = vld [vmem:[#allocation3 + $0x1e8] sm:$0xff]  ;;  %v251_v56 = vpack.c.bf16 %v139_v51, %v137_v50 }
  0x42   :  { %v240_v6 = vpack.c.bf16 %v118_v63, %v116_v62  ;;  %v267_v57 = vpack.c.bf16 %v171_v53, %v169_v52 }
  0x44   :  { %383 = vmatpush2.bf16.msra.mxu0 %v296_v3  ;;  %859 = vmatpush2.bf16.msra.mxu1 %v296_v3  ;;  %v123_v3 = vld [vmem:[#allocation3 + $0x78] sm:$0xff] }
  0x45   :  { %384 = vmatprep.subr.bf16.mxu0 %v295_v4  ;;  %844 = vmatprep.subr.bf16.mxu1 %v295_v4  ;;  %v153_v4 = vld [vmem:[#allocation3 + $0x168] sm:$0xff]  ;;  %v243_v8 = vpack.c.bf16 %v123_v3, %v121_v2 }
  0x48   :  { %385 = vmatpush2.bf16.msra.mxu0 %v294_v9  ;;  %860 = vmatpush2.bf16.msra.mxu1 %v294_v9  ;;  %v259_v9 = vpack.c.bf16 %v155_v5, %v153_v4 }
  0x49   :  { %386 = vmatprep.subr.bf16.mxu0 %v293_v10  ;;  %845 = vmatprep.subr.bf16.mxu1 %v293_v10  ;;  %v120_v10 = vld [vmem:[#allocation3 + $0x60] sm:$0xff] }
  0x4a   :  { %v242_v18 = vpack.c.bf16 %v122_v11, %v120_v10 }
  0x4c   :  { %387 = vmatpush2.bf16.msra.mxu0 %v292_v15  ;;  %861 = vmatpush2.bf16.msra.mxu1 %v292_v15  ;;  %v127_v15 = vld [vmem:[#allocation3 + $0x98] sm:$0xff] }
  0x4d   :  { %388 = vmatprep.subr.bf16.mxu0 %v291_v16  ;;  %846 = vmatprep.subr.bf16.mxu1 %v291_v16  ;;  %v157_v16 = vld [vmem:[#allocation3 + $0x188] sm:$0xff]  ;;  %v245_v20 = vpack.c.bf16 %v127_v15, %v125_v14 }
  0x50   :  { %389 = vmatpush2.bf16.msra.mxu0 %v290_v21  ;;  %862 = vmatpush2.bf16.msra.mxu1 %v290_v21  ;;  %v261_v21 = vpack.c.bf16 %v159_v17, %v157_v16 }
  0x51   :  { %390 = vmatprep.subr.bf16.mxu0 %v289_v22  ;;  %847 = vmatprep.subr.bf16.mxu1 %v289_v22  ;;  %v124_v22 = vld [vmem:[#allocation3 + $0x80] sm:$0xff] }
  0x52   :  { %v244_v30 = vpack.c.bf16 %v126_v23, %v124_v22 }
  0x54   :  { %391 = vmatpush2.bf16.msra.mxu0 %v288_v27  ;;  %863 = vmatpush2.bf16.msra.mxu1 %v288_v27  ;;  %v131_v27 = vld [vmem:[#allocation3 + $0xb8] sm:$0xff] }
  0x55   :  { %392 = vmatprep.subr.bf16.mxu0 %v287_v28  ;;  %848 = vmatprep.subr.bf16.mxu1 %v287_v28  ;;  %v161_v28 = vld [vmem:[#allocation3 + $0x1a8] sm:$0xff]  ;;  %v247_v32 = vpack.c.bf16 %v131_v27, %v129_v26 }
  0x58   :  { %393 = vmatpush2.bf16.msra.mxu0 %v286_v33  ;;  %864 = vmatpush2.bf16.msra.mxu1 %v286_v33  ;;  %v263_v33 = vpack.c.bf16 %v163_v29, %v161_v28 }
  0x59   :  { %394 = vmatprep.subr.bf16.mxu0 %v285_v34  ;;  %849 = vmatprep.subr.bf16.mxu1 %v285_v34  ;;  %v128_v34 = vld [vmem:[#allocation3 + $0xa0] sm:$0xff] }
  0x5a   :  { %v246_v42 = vpack.c.bf16 %v130_v35, %v128_v34 }
  0x5c   :  { %395 = vmatpush2.bf16.msra.mxu0 %v284_v39  ;;  %865 = vmatpush2.bf16.msra.mxu1 %v284_v39  ;;  %v135_v39 = vld [vmem:[#allocation3 + $0xd8] sm:$0xff] }
  0x5d   :  { %v249_v44 = vpack.c.bf16 %v135_v39, %v133_v38 }
  0x5f   :  { %397 = vmatmul.mubr.bf16.vlgmr.msra.gmra.mxu0 %v236_v46  ;;  %477 = vmatmul.mubr.bf16.vlgmr.msra.gmra.mxu1 %v252_v47  ;;  %v132_v46 = vld [vmem:[#allocation3 + $0xc0] sm:$0xff]  ;;  %v134_v47 = vld [vmem:[#allocation3 + $0xd0] sm:$0xff] }
  0x60   :  { %406 = vmatprep.mubr.bf16.mxu0 %v239_v48  ;;  %486 = vmatprep.mubr.bf16.mxu1 %v255_v49  ;;  %v164_v48 = vld [vmem:[#allocation3 + $0x1c0] sm:$0xff]  ;;  %v166_v49 = vld [vmem:[#allocation3 + $0x1d0] sm:$0xff]  ;;  %v248_v54 = vpack.c.bf16 %v134_v47, %v132_v46 }
  0x61   :  { %v264_v55 = vpack.c.bf16 %v166_v49, %v164_v48 }
  0x67   :  { %407 = vmatmul.mubr.bf16.gmra.mxu0 %v238_v58  ;;  %487 = vmatmul.mubr.bf16.gmra.mxu1 %v254_v59  ;;  %v136_v58 = vld [vmem:[#allocation3 + $0xe0] sm:$0xff]  ;;  %v138_v59 = vld [vmem:[#allocation3 + $0xf0] sm:$0xff] }
  0x68   :  { %416 = vmatprep.mubr.bf16.mxu0 %v241_v60  ;;  %496 = vmatprep.mubr.bf16.mxu1 %v257_v61  ;;  %v168_v60 = vld [vmem:[#allocation3 + $0x1e0] sm:$0xff]  ;;  %v170_v61 = vld [vmem:[#allocation3 + $0x1f0] sm:$0xff]  ;;  %v250_v62 = vpack.c.bf16 %v138_v59, %v136_v58 }
  0x69   :  { %v266_v63 = vpack.c.bf16 %v170_v61, %v168_v60 }
  0x6f   :  { %417 = vmatmul.mubr.bf16.gmra.mxu0 %v240_v6  ;;  %497 = vmatmul.mubr.bf16.gmra.mxu1 %v256_v7 }
  0x70   :  { %426 = vmatprep.mubr.bf16.mxu0 %v243_v8  ;;  %506 = vmatprep.mubr.bf16.mxu1 %v259_v9 }
  0x77   :  { %427 = vmatmul.mubr.bf16.gmra.mxu0 %v242_v18  ;;  %507 = vmatmul.mubr.bf16.gmra.mxu1 %v258_v19 }
  0x78   :  { %436 = vmatprep.mubr.bf16.mxu0 %v245_v20  ;;  %516 = vmatprep.mubr.bf16.mxu1 %v261_v21 }
  0x7f   :  { %437 = vmatmul.mubr.bf16.gmra.mxu0 %v244_v30  ;;  %517 = vmatmul.mubr.bf16.gmra.mxu1 %v260_v31 }
  0x80   :  { %446 = vmatprep.mubr.bf16.mxu0 %v247_v32  ;;  %526 = vmatprep.mubr.bf16.mxu1 %v263_v33 }
  0x87   :  { %447 = vmatmul.mubr.bf16.gmra.mxu0 %v246_v42  ;;  %527 = vmatmul.mubr.bf16.gmra.mxu1 %v262_v43 }
  0x88   :  { %456 = vmatprep.mubr.bf16.mxu0 %v249_v44  ;;  %536 = vmatprep.mubr.bf16.mxu1 %v265_v45 }
  0x8f   :  { %457 = vmatmul.mubr.bf16.gmra.mxu0 %v248_v54  ;;  %537 = vmatmul.mubr.bf16.gmra.mxu1 %v264_v55 }
  0x90   :  { %466 = vmatprep.mubr.bf16.mxu0 %v251_v56  ;;  %546 = vmatprep.mubr.bf16.mxu1 %v267_v57 }
  0x97   :  { %467 = vmatmul.mubr.bf16.gmra.mxu0 %v250_v62  ;;  %547 = vmatmul.mubr.bf16.gmra.mxu1 %v266_v63 }
 0x11f   :  { %v398_v0 = vpop.f32.mrf.mxu0  ;;  %v478_v1 = vpop.f32.mrf.mxu1 }
 0x120   :  { %752 = vst [vmem:[#allocation8] sm:$0xff] %v398_v0  ;;  %784 = vst [vmem:[#allocation8 + $0x100] sm:$0xff] %v478_v1 }
 0x121   :  { %v400_v2 = vpop.f32.mrf.mxu0  ;;  %v480_v3 = vpop.f32.mrf.mxu1 }
 0x122   :  { %753 = vst [vmem:[#allocation8 + $0x8] sm:$0xff] %v400_v2  ;;  %785 = vst [vmem:[#allocation8 + $0x108] sm:$0xff] %v480_v3 }
 0x123   :  { %v402_v4 = vpop.f32.mrf.mxu0  ;;  %v482_v5 = vpop.f32.mrf.mxu1 }
 0x124   :  { %754 = vst [vmem:[#allocation8 + $0x10] sm:$0xff] %v402_v4  ;;  %786 = vst [vmem:[#allocation8 + $0x110] sm:$0xff] %v482_v5 }
 0x125   :  { %v404_v6 = vpop.f32.mrf.mxu0  ;;  %v484_v7 = vpop.f32.mrf.mxu1 }
 0x126   :  { %755 = vst [vmem:[#allocation8 + $0x18] sm:$0xff] %v404_v6  ;;  %787 = vst [vmem:[#allocation8 + $0x118] sm:$0xff] %v484_v7 }
 0x127   :  { %v408_v8 = vpop.f32.mrf.mxu0  ;;  %v488_v9 = vpop.f32.mrf.mxu1 }
 0x128   :  { %756 = vst [vmem:[#allocation8 + $0x20] sm:$0xff] %v408_v8  ;;  %788 = vst [vmem:[#allocation8 + $0x120] sm:$0xff] %v488_v9 }
 0x129   :  { %v410_v10 = vpop.f32.mrf.mxu0  ;;  %v490_v11 = vpop.f32.mrf.mxu1 }
 0x12a   :  { %757 = vst [vmem:[#allocation8 + $0x28] sm:$0xff] %v410_v10  ;;  %789 = vst [vmem:[#allocation8 + $0x128] sm:$0xff] %v490_v11 }
 0x12b   :  { %v412_v12 = vpop.f32.mrf.mxu0  ;;  %v492_v13 = vpop.f32.mrf.mxu1 }
 0x12c   :  { %758 = vst [vmem:[#allocation8 + $0x30] sm:$0xff] %v412_v12  ;;  %790 = vst [vmem:[#allocation8 + $0x130] sm:$0xff] %v492_v13 }
 0x12d   :  { %v414_v14 = vpop.f32.mrf.mxu0  ;;  %v494_v15 = vpop.f32.mrf.mxu1 }
 0x12e   :  { %759 = vst [vmem:[#allocation8 + $0x38] sm:$0xff] %v414_v14  ;;  %791 = vst [vmem:[#allocation8 + $0x138] sm:$0xff] %v494_v15 }
 0x12f   :  { %v418_v16 = vpop.f32.mrf.mxu0  ;;  %v498_v17 = vpop.f32.mrf.mxu1 }
 0x130   :  { %760 = vst [vmem:[#allocation8 + $0x40] sm:$0xff] %v418_v16  ;;  %792 = vst [vmem:[#allocation8 + $0x140] sm:$0xff] %v498_v17 }
 0x131   :  { %v420_v18 = vpop.f32.mrf.mxu0  ;;  %v500_v19 = vpop.f32.mrf.mxu1 }
 0x132   :  { %761 = vst [vmem:[#allocation8 + $0x48] sm:$0xff] %v420_v18  ;;  %793 = vst [vmem:[#allocation8 + $0x148] sm:$0xff] %v500_v19 }
 0x133   :  { %v422_v20 = vpop.f32.mrf.mxu0  ;;  %v502_v21 = vpop.f32.mrf.mxu1 }
 0x134   :  { %762 = vst [vmem:[#allocation8 + $0x50] sm:$0xff] %v422_v20  ;;  %794 = vst [vmem:[#allocation8 + $0x150] sm:$0xff] %v502_v21 }
 0x135   :  { %v424_v22 = vpop.f32.mrf.mxu0  ;;  %v504_v23 = vpop.f32.mrf.mxu1 }
 0x136   :  { %763 = vst [vmem:[#allocation8 + $0x58] sm:$0xff] %v424_v22  ;;  %795 = vst [vmem:[#allocation8 + $0x158] sm:$0xff] %v504_v23 }
 0x137   :  { %v428_v24 = vpop.f32.mrf.mxu0  ;;  %v508_v25 = vpop.f32.mrf.mxu1 }
 0x138   :  { %764 = vst [vmem:[#allocation8 + $0x60] sm:$0xff] %v428_v24  ;;  %796 = vst [vmem:[#allocation8 + $0x160] sm:$0xff] %v508_v25 }
 0x139   :  { %v430_v26 = vpop.f32.mrf.mxu0  ;;  %v510_v27 = vpop.f32.mrf.mxu1 }
 0x13a   :  { %765 = vst [vmem:[#allocation8 + $0x68] sm:$0xff] %v430_v26  ;;  %797 = vst [vmem:[#allocation8 + $0x168] sm:$0xff] %v510_v27 }
 0x13b   :  { %v432_v28 = vpop.f32.mrf.mxu0  ;;  %v512_v29 = vpop.f32.mrf.mxu1 }
 0x13c   :  { %766 = vst [vmem:[#allocation8 + $0x70] sm:$0xff] %v432_v28  ;;  %798 = vst [vmem:[#allocation8 + $0x170] sm:$0xff] %v512_v29 }
 0x13d   :  { %v434_v30 = vpop.f32.mrf.mxu0  ;;  %v514_v31 = vpop.f32.mrf.mxu1 }
 0x13e   :  { %767 = vst [vmem:[#allocation8 + $0x78] sm:$0xff] %v434_v30  ;;  %799 = vst [vmem:[#allocation8 + $0x178] sm:$0xff] %v514_v31 }
 0x13f   :  { %v438_v32 = vpop.f32.mrf.mxu0  ;;  %v518_v33 = vpop.f32.mrf.mxu1 }
 0x140   :  { %768 = vst [vmem:[#allocation8 + $0x80] sm:$0xff] %v438_v32  ;;  %800 = vst [vmem:[#allocation8 + $0x180] sm:$0xff] %v518_v33 }
 0x141   :  { %v440_v34 = vpop.f32.mrf.mxu0  ;;  %v520_v35 = vpop.f32.mrf.mxu1 }
 0x142   :  { %769 = vst [vmem:[#allocation8 + $0x88] sm:$0xff] %v440_v34  ;;  %801 = vst [vmem:[#allocation8 + $0x188] sm:$0xff] %v520_v35 }
 0x143   :  { %v442_v36 = vpop.f32.mrf.mxu0  ;;  %v522_v37 = vpop.f32.mrf.mxu1 }
 0x144   :  { %770 = vst [vmem:[#allocation8 + $0x90] sm:$0xff] %v442_v36  ;;  %802 = vst [vmem:[#allocation8 + $0x190] sm:$0xff] %v522_v37 }
 0x145   :  { %v444_v38 = vpop.f32.mrf.mxu0  ;;  %v524_v39 = vpop.f32.mrf.mxu1 }
 0x146   :  { %771 = vst [vmem:[#allocation8 + $0x98] sm:$0xff] %v444_v38  ;;  %803 = vst [vmem:[#allocation8 + $0x198] sm:$0xff] %v524_v39 }
 0x147   :  { %v448_v40 = vpop.f32.mrf.mxu0  ;;  %v528_v41 = vpop.f32.mrf.mxu1 }
 0x148   :  { %772 = vst [vmem:[#allocation8 + $0xa0] sm:$0xff] %v448_v40  ;;  %804 = vst [vmem:[#allocation8 + $0x1a0] sm:$0xff] %v528_v41 }
 0x149   :  { %v450_v42 = vpop.f32.mrf.mxu0  ;;  %v530_v43 = vpop.f32.mrf.mxu1 }
 0x14a   :  { %773 = vst [vmem:[#allocation8 + $0xa8] sm:$0xff] %v450_v42  ;;  %805 = vst [vmem:[#allocation8 + $0x1a8] sm:$0xff] %v530_v43 }
 0x14b   :  { %v452_v44 = vpop.f32.mrf.mxu0  ;;  %v532_v45 = vpop.f32.mrf.mxu1 }
 0x14c   :  { %774 = vst [vmem:[#allocation8 + $0xb0] sm:$0xff] %v452_v44  ;;  %806 = vst [vmem:[#allocation8 + $0x1b0] sm:$0xff] %v532_v45 }
 0x14d   :  { %v454_v46 = vpop.f32.mrf.mxu0  ;;  %v534_v47 = vpop.f32.mrf.mxu1 }
 0x14e   :  { %775 = vst [vmem:[#allocation8 + $0xb8] sm:$0xff] %v454_v46  ;;  %807 = vst [vmem:[#allocation8 + $0x1b8] sm:$0xff] %v534_v47 }
 0x14f   :  { %v458_v48 = vpop.f32.mrf.mxu0  ;;  %v538_v49 = vpop.f32.mrf.mxu1 }
 0x150   :  { %776 = vst [vmem:[#allocation8 + $0xc0] sm:$0xff] %v458_v48  ;;  %808 = vst [vmem:[#allocation8 + $0x1c0] sm:$0xff] %v538_v49 }
 0x151   :  { %v460_v50 = vpop.f32.mrf.mxu0  ;;  %v540_v51 = vpop.f32.mrf.mxu1 }
 0x152   :  { %777 = vst [vmem:[#allocation8 + $0xc8] sm:$0xff] %v460_v50  ;;  %809 = vst [vmem:[#allocation8 + $0x1c8] sm:$0xff] %v540_v51 }
 0x153   :  { %v462_v52 = vpop.f32.mrf.mxu0  ;;  %v542_v53 = vpop.f32.mrf.mxu1 }
 0x154   :  { %778 = vst [vmem:[#allocation8 + $0xd0] sm:$0xff] %v462_v52  ;;  %810 = vst [vmem:[#allocation8 + $0x1d0] sm:$0xff] %v542_v53 }
 0x155   :  { %v464_v54 = vpop.f32.mrf.mxu0  ;;  %v544_v55 = vpop.f32.mrf.mxu1 }
 0x156   :  { %779 = vst [vmem:[#allocation8 + $0xd8] sm:$0xff] %v464_v54  ;;  %811 = vst [vmem:[#allocation8 + $0x1d8] sm:$0xff] %v544_v55 }
 0x157   :  { %v468_v56 = vpop.f32.mrf.mxu0  ;;  %v548_v57 = vpop.f32.mrf.mxu1 }
 0x158   :  { %780 = vst [vmem:[#allocation8 + $0xe0] sm:$0xff] %v468_v56  ;;  %812 = vst [vmem:[#allocation8 + $0x1e0] sm:$0xff] %v548_v57 }
 0x159   :  { %v470_v58 = vpop.f32.mrf.mxu0  ;;  %v550_v59 = vpop.f32.mrf.mxu1 }
 0x15a   :  { %781 = vst [vmem:[#allocation8 + $0xe8] sm:$0xff] %v470_v58  ;;  %813 = vst [vmem:[#allocation8 + $0x1e8] sm:$0xff] %v550_v59 }
 0x15b   :  { %v472_v60 = vpop.f32.mrf.mxu0  ;;  %v552_v61 = vpop.f32.mrf.mxu1 }
 0x15c   :  { %782 = vst [vmem:[#allocation8 + $0xf0] sm:$0xff] %v472_v60  ;;  %814 = vst [vmem:[#allocation8 + $0x1f0] sm:$0xff] %v552_v61 }
 0x15d   :  { %v474_v62 = vpop.f32.mrf.mxu0  ;;  %v554_v63 = vpop.f32.mrf.mxu1 }
 0x15e   :  { %783 = vst [vmem:[#allocation8 + $0xf8] sm:$0xff] %v474_v62  ;;  %815 = vst [vmem:[#allocation8 + $0x1f8] sm:$0xff] %v554_v63 }
 0x15f   :  { %922 = shalt.err (!%p919_p0)
}
 0x160   :  { %827 = dma.vmem_to_hbm [thread:$0]  %s822_s1, 8192, %s977_s2, [#allocation5], %s938_s12, %s938_s12, %s939_s13  }
 0x161   :  { %935 = dma.done.wait [#allocation5], 8192  }
 0x162   :  { %936 = vsyncadd [#allocation5], 4294959104 }
 0x163   :  { %831 = vsyncpa [#allocation4], 1 }
 0x164   :  { %832 = vsyncpa [#allocation7], 1 }
 0x165   :  { %833 = vsyncpa [#allocation5], 1 }

</bundles_post_ra>
